<compile_context>
chip_gen: v7x
topology: tpu7x:2x2x1
jax: 0.10.0
libtpu: 0.0.40
codegen_flags: <defaults>
</compile_context>

<pallas_src>
import functools

import jax
import jax.numpy as jnp
from jax import lax
from jax.experimental import pallas as pl
from jax.experimental.pallas import tpu as pltpu

KL_COEF = 0.0001
_NEG_BIG = -1e30  # finite "-inf" so masked columns never produce inf/nan arithmetic


def _round_up(x, m):
    return ((x + m - 1) // m) * m


def _cdiv(a, b):
    return -(-a // b)


def _chip_config():
    """Per-generation tiling / parallelism parameters (conservative, safe defaults)."""
    try:
        kind = jax.devices()[0].device_kind.lower()
    except Exception:
        kind = ""
    if "v7" in kind or "7x" in kind:
        # 2 TensorCores, 64 MiB physical VMEM per core -> smaller scoped limit.
        return dict(cores=2, vmem_limit=40 << 20, core_parallel=True)
    if "v5p" in kind or "v4" in kind:
        # Megacore: 2 TCs behind one device; classic "parallel" sharding.
        return dict(cores=2, vmem_limit=48 << 20, core_parallel=False)
    if "v6" in kind:
        return dict(cores=1, vmem_limit=64 << 20, core_parallel=False)
    if "v5" in kind:  # v5e / v5 lite
        return dict(cores=1, vmem_limit=48 << 20, core_parallel=False)
    return dict(cores=1, vmem_limit=32 << 20, core_parallel=False)


def _loss_vae_kernel(tgt_ref, rec_ref, mu_ref, lv_ref, dec_ref, kl_ref,
                     m_sc, l_sc, pick_sc, ce_acc, kl_acc,
                     *, b_true, n_cls, n_chunks, tgt_whole):
    p = pl.program_id(0)          # core-parallel axis
    i = pl.program_id(1)          # batch row-tile reduction axis
    c = pl.program_id(2)          # class-chunk axis (online logsumexp)
    nt = pl.num_programs(1)

    tb, cblk = rec_ref.shape
    # Intended (unclamped) global rows of this step.  Overshoot / partial tiles are
    # neutralised by this mask; the index maps clamp the actual DMA to a real block.
    row0 = (p * nt + i) * tb
    rows = row0 + lax.broadcasted_iota(jnp.int32, (tb, 1), 0)
    row_ok = rows < b_true
    valid = row_ok.astype(jnp.float32)

    @pl.when((i == 0) & (c == 0))
    def _init_partials():
        ce_acc[...] = jnp.zeros_like(ce_acc)
        kl_acc[...] = jnp.zeros_like(kl_acc)

    @pl.when(c == 0)
    def _start_row_tile():
        # Reset the online-logsumexp state for this row tile.
        m_sc[...] = jnp.full_like(m_sc, _NEG_BIG)
        l_sc[...] = jnp.zeros_like(l_sc)
        pick_sc[...] = jnp.zeros_like(pick_sc)
        # KL term, once per row tile (mu / log_var are not class-chunked); masked
        # rows contribute exactly 0.
        mu = mu_ref[...]
        lv = lv_ref[...]
        kl_el = 1.0 + lv - mu * mu - jnp.exp(lv)
        kl_acc[...] = kl_acc[...] + jnp.sum(jnp.where(row_ok, kl_el, 0.0),
                                            axis=-1, keepdims=True)

    # ---- cross entropy: streaming (online) logsumexp over class chunks ----
    logits = rec_ref[...]                                       # (TB, CBLK) f32
    col = c * cblk + lax.broadcasted_iota(jnp.int32, (tb, cblk), 1)
    x = logits
    if n_chunks > 1:
        x = jnp.where(col < n_cls, x, _NEG_BIG)                 # mask padded class cols
    x = jnp.where(row_ok, x, 0.0)                               # keep garbage rows finite

    m_prev = m_sc[...]
    m_new = jnp.maximum(m_prev, jnp.max(x, axis=-1, keepdims=True))
    l_sc[...] = l_sc[...] * jnp.exp(m_prev - m_new) + jnp.sum(
        jnp.exp(x - m_new), axis=-1, keepdims=True)
    m_sc[...] = m_new

    if tgt_whole:
        tgt = tgt_ref[pl.ds(pl.multiple_of(row0, 8), tb), :]    # (TB, 1) int32
    else:
        tgt = tgt_ref[...]                                      # (TB, 1) int32
    pick_sc[...] = pick_sc[...] + jnp.sum(jnp.where(col == tgt, x, 0.0),
                                          axis=-1, keepdims=True)

    @pl.when(c == n_chunks - 1)
    def _finish_row_tile():
        lse = m_sc[...] + jnp.log(l_sc[...])
        ce_acc[...] = ce_acc[...] + lse * valid - pick_sc[...]

    @pl.when((i == nt - 1) & (c == n_chunks - 1))
    def _epilogue():
        dec_p = jnp.sum(ce_acc[...]) * jnp.float32(1.0 / b_true)
        kl_p = jnp.sum(kl_acc[...]) * jnp.float32(-0.5 * KL_COEF / b_true)
        # Lane-dense (unmasked) writeback of this core's partial.
        dec_ref[...] = jnp.full(dec_ref.shape, dec_p, jnp.float32)
        kl_ref[...] = jnp.full(kl_ref.shape, kl_p, jnp.float32)


def loss_vae(line, line_rec, line_mu, log_var, *,
             num_parallel=None, max_tile_rows=None, max_tile_cols=None):
    """line: (B,) int; line_rec: (B, C) f32 logits; line_mu/log_var: (B, D) f32."""
    line_rec = line_rec.astype(jnp.float32)
    line_mu = line_mu.astype(jnp.float32)
    log_var = log_var.astype(jnp.float32)
    tgt = line.astype(jnp.int32).reshape(-1, 1)

    B, C = line_rec.shape
    D = line_mu.shape[1]

    cfg = _chip_config()
    cores = cfg["cores"] if num_parallel is None else max(1, int(num_parallel))
    vmem_limit = int(cfg["vmem_limit"])

    # Only a tiny batch (< 8 rows) ever gets a row pad (so the minimum 8-row block never
    # exceeds the array extent).  Everything else is consumed unpadded: partial/overshoot
    # row tiles and ragged class/latent dims are masked in-kernel (no HBM pad copies).
    R = B
    if R < 8:
        pad = 8 - R
        line_rec = jnp.pad(line_rec, ((0, pad), (0, 0)))
        line_mu = jnp.pad(line_mu, ((0, pad), (0, 0)))
        log_var = jnp.pad(log_var, ((0, pad), (0, 0)))
        R = 8

    Cp = _round_up(C, 128)   # physical lane width of a full-C block in VMEM
    Dp = _round_up(D, 128)

    # Whole target vector resident in VMEM (single DMA) unless the batch is huge.
    tgt_whole = B <= 4096

    usable = vmem_limit - (6 << 20) - ((4 << 20) if tgt_whole else 0)

    def per_row_bytes(c_lanes):
        io = c_lanes + 2 * Dp + (0 if tgt_whole else 128)
        return 8 * io + 5 * 512   # double-buffered f32 I/O + per-row f32 scratch

    # Class-dim streaming only when even an 8-row tile at full class width would blow the
    # VMEM budget (or when forced for testing).
    tcc = Cp if max_tile_cols is None else max(128, (int(max_tile_cols) // 128) * 128)
    if tcc >= Cp and 8 * per_row_bytes(Cp) > usable:
        tcc = (usable // 8 - 5 * 512) // 8 - 2 * Dp - (0 if tgt_whole else 128)
        tcc = max(128, (tcc // 128) * 128)
    if tcc >= Cp:
        n_chunks, c_blk, c_lanes = 1, C, Cp
    else:
        n_chunks, c_blk, c_lanes = _cdiv(C, tcc), tcc, tcc

    # Row-tile size: as large as the per-chip VMEM budget allows.
    tb_cap = max(8, (usable // per_row_bytes(c_lanes)) // 8 * 8)
    if max_tile_rows is not None:
        tb_cap = min(tb_cap, max(8, (int(max_tile_rows) // 8) * 8))
    TB = min(_round_up(_cdiv(R, cores), 8), max(8, (R // 8) * 8), tb_cap)

    NBLK = _cdiv(R, TB)                        # real row tiles
    npar = max(1, min(cores, NBLK))            # cores actually used
    NT = _cdiv(NBLK, npar)                     # row tiles per core (may overshoot)
    Bp = npar * NT * TB                        # rows "covered" by the grid

    def row_blk(p, i):                         # clamp overshoot tiles to the last real one
        return jnp.minimum(p * NT + i, NBLK - 1)

    if tgt_whole:
        if Bp > B:
            tgt = jnp.pad(tgt, ((0, Bp - B), (0, 0)))   # negligible (4 B / row)
        tgt_spec = pl.BlockSpec(memory_space=pltpu.MemorySpace.VMEM)
    else:
        tgt_spec = pl.BlockSpec((TB, 1), lambda p, i, c: (row_blk(p, i), 0))

    outer_sem = pltpu.PARALLEL
    if npar > 1 and cfg["core_parallel"]:
        outer_sem = getattr(pltpu, "CORE_PARALLEL", pltpu.PARALLEL)

    kernel = functools.partial(_loss_vae_kernel, b_true=B, n_cls=C,
                               n_chunks=n_chunks, tgt_whole=tgt_whole)

    dec_out, kl_out = pl.pallas_call(
        kernel,
        out_shape=(jax.ShapeDtypeStruct((npar, 8, 128), jnp.float32),
                   jax.ShapeDtypeStruct((npar, 8, 128), jnp.float32)),
        grid=(npar, NT, n_chunks),
        in_specs=[
            tgt_spec,
            pl.BlockSpec((TB, c_blk), lambda p, i, c: (row_blk(p, i), c)),
            pl.BlockSpec((TB, D), lambda p, i, c: (row_blk(p, i), 0)),
            pl.BlockSpec((TB, D), lambda p, i, c: (row_blk(p, i), 0)),
        ],
        out_specs=(
            pl.BlockSpec((1, 8, 128), lambda p, i, c: (p, 0, 0)),
            pl.BlockSpec((1, 8, 128), lambda p, i, c: (p, 0, 0)),
        ),
        scratch_shapes=[pltpu.VMEM((TB, 1), jnp.float32) for _ in range(5)],
        compiler_params=pltpu.CompilerParams(
            dimension_semantics=(outer_sem, pltpu.ARBITRARY, pltpu.ARBITRARY),
            vmem_limit_bytes=vmem_limit),
    )(tgt, line_rec, line_mu, log_var)

    dec_loss = jnp.sum(dec_out[:, 0, 0])
    kl_loss = jnp.sum(kl_out[:, 0, 0])
    return dec_loss, kl_loss


def _reference(line, line_rec, line_mu, log_var):
    logp = jax.nn.log_softmax(line_rec.astype(jnp.float32), axis=-1)
    dec = -jnp.mean(jnp.take_along_axis(logp, line[:, None].astype(jnp.int32), axis=-1))
    kl = 1.0 + log_var - line_mu ** 2 - jnp.exp(log_var)
    kl = jnp.mean(-0.5 * jnp.sum(kl, axis=-1)) * KL_COEF
    return dec, kl


if __name__ == "__main__":
    key = jax.random.PRNGKey(0)

    # Case 0: small aligned shapes (single tile, no masking needed).
    # Case 1: ragged B/C/D + forced multi-tile row reduction (partial last row tile,
    #         exercises the clamped/overshoot path on multi-core chips).
    # Case 2: forced class-dim streaming (online logsumexp, partial last class chunk).
    cases = [
        dict(B=8, C=32, D=32, kw={}),
        dict(B=20, C=10, D=16, kw=dict(max_tile_rows=8)),
        dict(B=24, C=200, D=48, kw=dict(max_tile_rows=8, max_tile_cols=128)),
    ]

    for idx, case in enumerate(cases):
        B, C, D = case["B"], case["C"], case["D"]
        k1, k2, k3, k4 = jax.random.split(jax.random.fold_in(key, idx), 4)
        line = jax.random.randint(k1, (B,), 0, C, dtype=jnp.int32)
        line_rec = jax.random.normal(k2, (B, C), dtype=jnp.float32)
        line_mu = jax.random.normal(k3, (B, D), dtype=jnp.float32) * 0.5
        log_var = jax.random.normal(k4, (B, D), dtype=jnp.float32) * 0.1

        dec_loss, kl_loss = loss_vae(line, line_rec, line_mu, log_var, **case["kw"])
        jax.block_until_ready((dec_loss, kl_loss))

        dec_ref, kl_ref = _reference(line, line_rec, line_mu, log_var)
        assert jnp.allclose(dec_loss, dec_ref, rtol=1e-5, atol=1e-5), (idx, dec_loss, dec_ref)
        assert jnp.allclose(kl_loss, kl_ref, rtol=1e-5, atol=1e-6), (idx, kl_loss, kl_ref)

    print("KERNEL_OK")
</pallas_src>

<mosaic_0001>
module attributes {stable_mosaic.version = 11 : i64} {
  func.func @_loss_vae_kernel(%arg0: i32, %arg1: i32, %arg2: i32, %arg3: memref<8x1xi32, #tpu.memory_space<vmem>>, %arg4: memref<8x32xf32, #tpu.memory_space<vmem>>, %arg5: memref<8x32xf32, #tpu.memory_space<vmem>>, %arg6: memref<8x32xf32, #tpu.memory_space<vmem>>, %arg7: memref<1x8x128xf32, #tpu.memory_space<vmem>>, %arg8: memref<1x8x128xf32, #tpu.memory_space<vmem>>, %arg9: memref<8x1xf32, #tpu.memory_space<vmem>>, %arg10: memref<8x1xf32, #tpu.memory_space<vmem>>, %arg11: memref<8x1xf32, #tpu.memory_space<vmem>>, %arg12: memref<8x1xf32, #tpu.memory_space<vmem>>, %arg13: memref<8x1xf32, #tpu.memory_space<vmem>>) attributes {dimension_semantics = [#tpu.dimension_semantics<parallel>, #tpu.dimension_semantics<arbitrary>, #tpu.dimension_semantics<arbitrary>], iteration_bounds = array<i64: 1, 1, 1>, scalar_prefetch = 0 : i64, scratch_operands = 5 : i64, tpu.core_type = #tpu.core_type<tc>, window_params = [{pipeline_mode = #tpu.pipeline_mode<synchronous>, transform_indices = @transform_0, window_bounds = array<i64: 8, 1>}, {transform_indices = @transform_1, window_bounds = array<i64: 8, 32>}, {transform_indices = @transform_2, window_bounds = array<i64: 8, 32>}, {transform_indices = @transform_3, window_bounds = array<i64: 8, 32>}, {transform_indices = @transform_4, window_bounds = array<i64: 1, 8, 128>}, {transform_indices = @transform_5, window_bounds = array<i64: 1, 8, 128>}]} {
    %c1_i32 = arith.constant 1 : i32
    %0 = arith.muli %arg0, %c1_i32 : i32
    %1 = arith.addi %0, %arg1 : i32
    %c8_i32 = arith.constant 8 : i32
    %2 = arith.muli %1, %c8_i32 : i32
    %3 = tpu.iota {dimensions = array<i32: 0>} : vector<8x1xi32>
    %4 = vector.broadcast %2 : i32 to vector<8x1xi32>
    %5 = arith.addi %4, %3 : vector<8x1xi32>
    %c8_i32_0 = arith.constant 8 : i32
    %6 = vector.broadcast %c8_i32_0 : i32 to vector<8x1xi32>
    %7 = arith.cmpi slt, %5, %6 : vector<8x1xi32>
    %8 = arith.extui %7 : vector<8x1xi1> to vector<8x1xi32>
    %9 = arith.sitofp %8 : vector<8x1xi32> to vector<8x1xf32>
    %c0_i32 = arith.constant 0 : i32
    %10 = arith.cmpi eq, %arg1, %c0_i32 : i32
    %c0_i32_1 = arith.constant 0 : i32
    %11 = arith.cmpi eq, %arg2, %c0_i32_1 : i32
    %12 = arith.andi %10, %11 : i1
    %13 = arith.extui %12 : i1 to i32
    %c0_i32_2 = arith.constant 0 : i32
    %14 = arith.cmpi ne, %13, %c0_i32_2 : i32
    scf.if %14 {
      %cst_28 = arith.constant 0.000000e+00 : f32
      %63 = vector.broadcast %cst_28 : f32 to vector<8x1xf32>
      %c0_29 = arith.constant 0 : index
      %c0_30 = arith.constant 0 : index
      %64 = vector.load %arg12[%c0_29, %c0_30] : memref<8x1xf32, #tpu.memory_space<vmem>>, vector<8x1xf32>
      tpu.vector_store %arg12[%c0_29, %c0_30], %63 {strides = array<i32>} : memref<8x1xf32, #tpu.memory_space<vmem>>, vector<8x1xf32>,
      %cst_31 = arith.constant 0.000000e+00 : f32
      %65 = vector.broadcast %cst_31 : f32 to vector<8x1xf32>
      %c0_32 = arith.constant 0 : index
      %c0_33 = arith.constant 0 : index
      %66 = vector.load %arg13[%c0_32, %c0_33] : memref<8x1xf32, #tpu.memory_space<vmem>>, vector<8x1xf32>
      tpu.vector_store %arg13[%c0_32, %c0_33], %65 {strides = array<i32>} : memref<8x1xf32, #tpu.memory_space<vmem>>, vector<8x1xf32>,
    } else {
    }
    %c0_i32_3 = arith.constant 0 : i32
    %15 = arith.cmpi eq, %arg2, %c0_i32_3 : i32
    %16 = arith.extui %15 : i1 to i32
    %c0_i32_4 = arith.constant 0 : i32
    %17 = arith.cmpi ne, %16, %c0_i32_4 : i32
    scf.if %17 {
      %cst_28 = arith.constant -1.000000e+30 : f32
      %63 = vector.broadcast %cst_28 : f32 to vector<8x1xf32>
      %c0_29 = arith.constant 0 : index
      %c0_30 = arith.constant 0 : index
      %64 = vector.load %arg9[%c0_29, %c0_30] : memref<8x1xf32, #tpu.memory_space<vmem>>, vector<8x1xf32>
      tpu.vector_store %arg9[%c0_29, %c0_30], %63 {strides = array<i32>} : memref<8x1xf32, #tpu.memory_space<vmem>>, vector<8x1xf32>,
      %cst_31 = arith.constant 0.000000e+00 : f32
      %65 = vector.broadcast %cst_31 : f32 to vector<8x1xf32>
      %c0_32 = arith.constant 0 : index
      %c0_33 = arith.constant 0 : index
      %66 = vector.load %arg10[%c0_32, %c0_33] : memref<8x1xf32, #tpu.memory_space<vmem>>, vector<8x1xf32>
      tpu.vector_store %arg10[%c0_32, %c0_33], %65 {strides = array<i32>} : memref<8x1xf32, #tpu.memory_space<vmem>>, vector<8x1xf32>,
      %cst_34 = arith.constant 0.000000e+00 : f32
      %67 = vector.broadcast %cst_34 : f32 to vector<8x1xf32>
      %c0_35 = arith.constant 0 : index
      %c0_36 = arith.constant 0 : index
      %68 = vector.load %arg11[%c0_35, %c0_36] : memref<8x1xf32, #tpu.memory_space<vmem>>, vector<8x1xf32>
      tpu.vector_store %arg11[%c0_35, %c0_36], %67 {strides = array<i32>} : memref<8x1xf32, #tpu.memory_space<vmem>>, vector<8x1xf32>,
      %c0_37 = arith.constant 0 : index
      %c0_38 = arith.constant 0 : index
      %69 = vector.load %arg5[%c0_37, %c0_38] : memref<8x32xf32, #tpu.memory_space<vmem>>, vector<8x32xf32>
      %c0_39 = arith.constant 0 : index
      %c0_40 = arith.constant 0 : index
      %70 = vector.load %arg6[%c0_39, %c0_40] : memref<8x32xf32, #tpu.memory_space<vmem>>, vector<8x32xf32>
      %cst_41 = arith.constant 1.000000e+00 : f32
      %71 = vector.broadcast %cst_41 : f32 to vector<8x32xf32>
      %72 = arith.addf %71, %70 : vector<8x32xf32>
      %73 = arith.mulf %69, %69 : vector<8x32xf32>
      %74 = arith.subf %72, %73 : vector<8x32xf32>
      %75 = math.exp %70 : vector<8x32xf32>
      %76 = arith.subf %74, %75 : vector<8x32xf32>
      %c0_42 = arith.constant 0 : index
      %c0_43 = arith.constant 0 : index
      %77 = vector.load %arg13[%c0_42, %c0_43] : memref<8x1xf32, #tpu.memory_space<vmem>>, vector<8x1xf32>
      %cst_44 = arith.constant 0.000000e+00 : f32
      %78 = vector.shape_cast %7 : vector<8x1xi1> to vector<8x1xi1>
      %79 = vector.broadcast %78 : vector<8x1xi1> to vector<8x32xi1>
      %80 = vector.broadcast %cst_44 : f32 to vector<8x32xf32>
      %81 = arith.select %79, %76, %80 : vector<8x32xi1>, vector<8x32xf32>
      %cst_45 = arith.constant dense<0.000000e+00> : vector<8xf32>
      %82 = vector.multi_reduction <add>, %81, %cst_45 [1] : vector<8x32xf32> to vector<8xf32>
      %83 = vector.shape_cast %82 : vector<8xf32> to vector<8x1xf32>
      %84 = arith.addf %77, %83 : vector<8x1xf32>
      %c0_46 = arith.constant 0 : index
      %c0_47 = arith.constant 0 : index
      %85 = vector.load %arg13[%c0_46, %c0_47] : memref<8x1xf32, #tpu.memory_space<vmem>>, vector<8x1xf32>
      tpu.vector_store %arg13[%c0_46, %c0_47], %84 {strides = array<i32>} : memref<8x1xf32, #tpu.memory_space<vmem>>, vector<8x1xf32>,
    } else {
    }
    %c0 = arith.constant 0 : index
    %c0_5 = arith.constant 0 : index
    %18 = vector.load %arg4[%c0, %c0_5] : memref<8x32xf32, #tpu.memory_space<vmem>>, vector<8x32xf32>
    %c32_i32 = arith.constant 32 : i32
    %19 = arith.muli %arg2, %c32_i32 : i32
    %20 = tpu.iota {dimensions = array<i32: 1>} : vector<8x32xi32>
    %21 = vector.broadcast %19 : i32 to vector<8x32xi32>
    %22 = arith.addi %21, %20 : vector<8x32xi32>
    %cst = arith.constant 0.000000e+00 : f32
    %23 = vector.shape_cast %7 : vector<8x1xi1> to vector<8x1xi1>
    %24 = vector.broadcast %23 : vector<8x1xi1> to vector<8x32xi1>
    %25 = vector.broadcast %cst : f32 to vector<8x32xf32>
    %26 = arith.select %24, %18, %25 : vector<8x32xi1>, vector<8x32xf32>
    %c0_6 = arith.constant 0 : index
    %c0_7 = arith.constant 0 : index
    %27 = vector.load %arg9[%c0_6, %c0_7] : memref<8x1xf32, #tpu.memory_space<vmem>>, vector<8x1xf32>
    %cst_8 = arith.constant dense<0xFF800000> : vector<8xf32>
    %28 = vector.multi_reduction <maximumf>, %26, %cst_8 [1] : vector<8x32xf32> to vector<8xf32>
    %29 = vector.shape_cast %28 : vector<8xf32> to vector<8x1xf32>
    %30 = arith.maximumf %27, %29 : vector<8x1xf32>
    %c0_9 = arith.constant 0 : index
    %c0_10 = arith.constant 0 : index
    %31 = vector.load %arg10[%c0_9, %c0_10] : memref<8x1xf32, #tpu.memory_space<vmem>>, vector<8x1xf32>
    %32 = arith.subf %27, %30 : vector<8x1xf32>
    %33 = math.exp %32 : vector<8x1xf32>
    %34 = arith.mulf %31, %33 : vector<8x1xf32>
    %35 = vector.broadcast %30 : vector<8x1xf32> to vector<8x32xf32>
    %36 = arith.subf %26, %35 : vector<8x32xf32>
    %37 = math.exp %36 : vector<8x32xf32>
    %cst_11 = arith.constant dense<0.000000e+00> : vector<8xf32>
    %38 = vector.multi_reduction <add>, %37, %cst_11 [1] : vector<8x32xf32> to vector<8xf32>
    %39 = vector.shape_cast %38 : vector<8xf32> to vector<8x1xf32>
    %40 = arith.addf %34, %39 : vector<8x1xf32>
    %c0_12 = arith.constant 0 : index
    %c0_13 = arith.constant 0 : index
    %41 = vector.load %arg10[%c0_12, %c0_13] : memref<8x1xf32, #tpu.memory_space<vmem>>, vector<8x1xf32>
    tpu.vector_store %arg10[%c0_12, %c0_13], %40 {strides = array<i32>} : memref<8x1xf32, #tpu.memory_space<vmem>>, vector<8x1xf32>,
    %c0_14 = arith.constant 0 : index
    %c0_15 = arith.constant 0 : index
    %42 = vector.load %arg9[%c0_14, %c0_15] : memref<8x1xf32, #tpu.memory_space<vmem>>, vector<8x1xf32>
    tpu.vector_store %arg9[%c0_14, %c0_15], %30 {strides = array<i32>} : memref<8x1xf32, #tpu.memory_space<vmem>>, vector<8x1xf32>,
    %43 = tpu.assume_multiple %2, 8 : i32
    %44 = arith.index_cast %43 : i32 to index
    %c0_16 = arith.constant 0 : index
    %45 = vector.load %arg3[%44, %c0_16] : memref<8x1xi32, #tpu.memory_space<vmem>>, vector<8x1xi32>
    %c0_17 = arith.constant 0 : index
    %c0_18 = arith.constant 0 : index
    %46 = vector.load %arg11[%c0_17, %c0_18] : memref<8x1xf32, #tpu.memory_space<vmem>>, vector<8x1xf32>
    %47 = vector.broadcast %45 : vector<8x1xi32> to vector<8x32xi32>
    %48 = arith.cmpi eq, %22, %47 : vector<8x32xi32>
    %cst_19 = arith.constant 0.000000e+00 : f32
    %49 = vector.broadcast %cst_19 : f32 to vector<8x32xf32>
    %50 = arith.select %48, %26, %49 : vector<8x32xi1>, vector<8x32xf32>
    %cst_20 = arith.constant dense<0.000000e+00> : vector<8xf32>
    %51 = vector.multi_reduction <add>, %50, %cst_20 [1] : vector<8x32xf32> to vector<8xf32>
    %52 = vector.shape_cast %51 : vector<8xf32> to vector<8x1xf32>
    %53 = arith.addf %46, %52 : vector<8x1xf32>
    %c0_21 = arith.constant 0 : index
    %c0_22 = arith.constant 0 : index
    %54 = vector.load %arg11[%c0_21, %c0_22] : memref<8x1xf32, #tpu.memory_space<vmem>>, vector<8x1xf32>
    tpu.vector_store %arg11[%c0_21, %c0_22], %53 {strides = array<i32>} : memref<8x1xf32, #tpu.memory_space<vmem>>, vector<8x1xf32>,
    %c0_i32_23 = arith.constant 0 : i32
    %55 = arith.cmpi eq, %arg2, %c0_i32_23 : i32
    %56 = arith.extui %55 : i1 to i32
    %c0_i32_24 = arith.constant 0 : i32
    %57 = arith.cmpi ne, %56, %c0_i32_24 : i32
    scf.if %57 {
      %c0_28 = arith.constant 0 : index
      %c0_29 = arith.constant 0 : index
      %63 = vector.load %arg9[%c0_28, %c0_29] : memref<8x1xf32, #tpu.memory_space<vmem>>, vector<8x1xf32>
      %c0_30 = arith.constant 0 : index
      %c0_31 = arith.constant 0 : index
      %64 = vector.load %arg10[%c0_30, %c0_31] : memref<8x1xf32, #tpu.memory_space<vmem>>, vector<8x1xf32>
      %65 = math.log %64 : vector<8x1xf32>
      %66 = arith.addf %63, %65 : vector<8x1xf32>
      %c0_32 = arith.constant 0 : index
      %c0_33 = arith.constant 0 : index
      %67 = vector.load %arg12[%c0_32, %c0_33] : memref<8x1xf32, #tpu.memory_space<vmem>>, vector<8x1xf32>
      %68 = arith.mulf %66, %9 : vector<8x1xf32>
      %69 = arith.addf %67, %68 : vector<8x1xf32>
      %c0_34 = arith.constant 0 : index
      %c0_35 = arith.constant 0 : index
      %70 = vector.load %arg11[%c0_34, %c0_35] : memref<8x1xf32, #tpu.memory_space<vmem>>, vector<8x1xf32>
      %71 = arith.subf %69, %70 : vector<8x1xf32>
      %c0_36 = arith.constant 0 : index
      %c0_37 = arith.constant 0 : index
      %72 = vector.load %arg12[%c0_36, %c0_37] : memref<8x1xf32, #tpu.memory_space<vmem>>, vector<8x1xf32>
      tpu.vector_store %arg12[%c0_36, %c0_37], %71 {strides = array<i32>} : memref<8x1xf32, #tpu.memory_space<vmem>>, vector<8x1xf32>,
    } else {
    }
    %c0_i32_25 = arith.constant 0 : i32
    %58 = arith.cmpi eq, %arg1, %c0_i32_25 : i32
    %c0_i32_26 = arith.constant 0 : i32
    %59 = arith.cmpi eq, %arg2, %c0_i32_26 : i32
    %60 = arith.andi %58, %59 : i1
    %61 = arith.extui %60 : i1 to i32
    %c0_i32_27 = arith.constant 0 : i32
    %62 = arith.cmpi ne, %61, %c0_i32_27 : i32
    scf.if %62 {
      %c0_28 = arith.constant 0 : index
      %c0_29 = arith.constant 0 : index
      %63 = vector.load %arg12[%c0_28, %c0_29] : memref<8x1xf32, #tpu.memory_space<vmem>>, vector<8x1xf32>
      %64 = vector.shape_cast %63 : vector<8x1xf32> to vector<1x8x1xf32>
      %cst_30 = arith.constant dense<0.000000e+00> : vector<1xf32>
      %65 = vector.multi_reduction <add>, %64, %cst_30 [1, 2] : vector<1x8x1xf32> to vector<1xf32>
      %66 = vector.shape_cast %65 : vector<1xf32> to vector<1x1x1xf32>
      %67 = vector.extract %66[0, 0, 0] : f32 from vector<1x1x1xf32>
      %cst_31 = arith.constant 1.250000e-01 : f32
      %68 = arith.mulf %67, %cst_31 : f32
      %c0_32 = arith.constant 0 : index
      %c0_33 = arith.constant 0 : index
      %69 = vector.load %arg13[%c0_32, %c0_33] : memref<8x1xf32, #tpu.memory_space<vmem>>, vector<8x1xf32>
      %70 = vector.shape_cast %69 : vector<8x1xf32> to vector<1x8x1xf32>
      %cst_34 = arith.constant dense<0.000000e+00> : vector<1xf32>
      %71 = vector.multi_reduction <add>, %70, %cst_34 [1, 2] : vector<1x8x1xf32> to vector<1xf32>
      %72 = vector.shape_cast %71 : vector<1xf32> to vector<1x1x1xf32>
      %73 = vector.extract %72[0, 0, 0] : f32 from vector<1x1x1xf32>
      %cst_35 = arith.constant -6.250000e-06 : f32
      %74 = arith.mulf %73, %cst_35 : f32
      %75 = vector.broadcast %68 : f32 to vector<1x8x128xf32>
      %c0_36 = arith.constant 0 : index
      %c0_37 = arith.constant 0 : index
      %c0_38 = arith.constant 0 : index
      %76 = vector.load %arg7[%c0_36, %c0_37, %c0_38] : memref<1x8x128xf32, #tpu.memory_space<vmem>>, vector<1x8x128xf32>
      tpu.vector_store %arg7[%c0_36, %c0_37, %c0_38], %75 {strides = array<i32>} : memref<1x8x128xf32, #tpu.memory_space<vmem>>, vector<1x8x128xf32>,
      %77 = vector.broadcast %74 : f32 to vector<1x8x128xf32>
      %c0_39 = arith.constant 0 : index
      %c0_40 = arith.constant 0 : index
      %c0_41 = arith.constant 0 : index
      %78 = vector.load %arg8[%c0_39, %c0_40, %c0_41] : memref<1x8x128xf32, #tpu.memory_space<vmem>>, vector<1x8x128xf32>
      tpu.vector_store %arg8[%c0_39, %c0_40, %c0_41], %77 {strides = array<i32>} : memref<1x8x128xf32, #tpu.memory_space<vmem>>, vector<1x8x128xf32>,
    } else {
    }
    return
  }
  func.func @transform_0(%arg0: i32, %arg1: i32, %arg2: i32) -> (i32, i32) {
    %c0_i32 = arith.constant 0 : i32
    %c0_i32_0 = arith.constant 0 : i32
    %c0_i32_1 = arith.constant 0 : i32
    return %c0_i32, %c0_i32_0 : i32, i32
  }
  func.func @transform_1(%arg0: i32, %arg1: i32, %arg2: i32) -> (i32, i32) {
    %c1_i32 = arith.constant 1 : i32
    %0 = arith.muli %arg0, %c1_i32 : i32
    %1 = arith.addi %0, %arg1 : i32
    %c0_i32 = arith.constant 0 : i32
    %2 = arith.minsi %1, %c0_i32 : i32
    %c0_i32_0 = arith.constant 0 : i32
    return %2, %arg2 : i32, i32
  }
  func.func @transform_2(%arg0: i32, %arg1: i32, %arg2: i32) -> (i32, i32) {
    %c1_i32 = arith.constant 1 : i32
    %0 = arith.muli %arg0, %c1_i32 : i32
    %1 = arith.addi %0, %arg1 : i32
    %c0_i32 = arith.constant 0 : i32
    %2 = arith.minsi %1, %c0_i32 : i32
    %c0_i32_0 = arith.constant 0 : i32
    %c0_i32_1 = arith.constant 0 : i32
    return %2, %c0_i32_0 : i32, i32
  }
  func.func @transform_3(%arg0: i32, %arg1: i32, %arg2: i32) -> (i32, i32) {
    %c1_i32 = arith.constant 1 : i32
    %0 = arith.muli %arg0, %c1_i32 : i32
    %1 = arith.addi %0, %arg1 : i32
    %c0_i32 = arith.constant 0 : i32
    %2 = arith.minsi %1, %c0_i32 : i32
    %c0_i32_0 = arith.constant 0 : i32
    %c0_i32_1 = arith.constant 0 : i32
    return %2, %c0_i32_0 : i32, i32
  }
  func.func @transform_4(%arg0: i32, %arg1: i32, %arg2: i32) -> (i32, i32, i32) {
    %c0_i32 = arith.constant 0 : i32
    %c0_i32_0 = arith.constant 0 : i32
    %c0_i32_1 = arith.constant 0 : i32
    return %arg0, %c0_i32, %c0_i32_0 : i32, i32, i32
  }
  func.func @transform_5(%arg0: i32, %arg1: i32, %arg2: i32) -> (i32, i32, i32) {
    %c0_i32 = arith.constant 0 : i32
    %c0_i32_0 = arith.constant 0 : i32
    %c0_i32_1 = arith.constant 0 : i32
    return %arg0, %c0_i32, %c0_i32_0 : i32, i32, i32
  }
}

</mosaic_0001>

<bundles_post_ra>
// kernel: tpu_custom_call.1
= control target key start
LH: loop header
LB: loop body
LE: loop exit
PB: predicated region body
PF: predicated region fallthrough
CT: control target
= control target key end

     0   :  { %11 = vsyncpa [#allocation8], 0  ;;  %s467_s0 = inlined_call_operand.vmem [shape: s32[8,1], index: 0, kind: input, shape index: {}]   ;;  %s468_s1 = inlined_call_operand.vmem [shape: f32[8,32], index: 1, kind: input, shape index: {}]   ;;  %s469_s2 = inlined_call_operand.vmem [shape: f32[8,32], index: 2, kind: input, shape index: {}]   ;;  %s470_s3 = inlined_call_operand.hbm [shape: f32[8,32], index: 3, kind: input, shape index: {}]   ;;  %s471_s4 = inlined_call_operand.hbm [shape: f32[1,8,128], index: 4, kind: output, shape index: {0}]   ;;  %s472_s5 = inlined_call_operand.hbm [shape: f32[1,8,128], index: 5, kind: output, shape index: {1}]  }
   0x1   :  { %12 = vsyncpa [#allocation9], 0 }
   0x2   :  { %13 = vsyncpa [#allocation12], 0  ;;  %s363_s18 = smov [#allocation7]   ;;  %s291_s22 = scalar_lea.hbm %s470_s3, 128 }
   0x3   :  { %s51_s19 = sshll.u32 %s363_s18, 4  ;;  %p292_p0 = scmp.ne.s32.totalorder %s470_s3, %s291_s22  ;;  %s52_s19 = int_to_ptr.vmem [resolvable:$true] %s51_s19 }
   0x4   :  { %p295_p1 = scmp.lt.u32.totalorder %s291_s22, %s470_s3 }
   0x6   :  { %p297_p2 = pnand %p295_p1, %p292_p0 }
   0x8   :  { %300 = shalt.err (!%p297_p2)
}
   0x9   :  { %s301_s27 = scalar_lea.vmem %s52_s19, 128  ;;  %p306_p4 = scmp.lt.s32.totalorder %s52_s19, %s52_s19 }
   0xa   :  { %p302_p3 = scmp.ne.s32.totalorder %s52_s19, %s301_s27  ;;  %p307_p5 = scmp.lt.s32.totalorder %s301_s27, %s301_s27 }
   0xc   :  { %p308_p6 = por %p307_p5, %p306_p4 }
   0xe   :  { %p309_p7 = pnand %p308_p6, %p302_p3 }
  0x10   :  { %312 = shalt.err (!%p309_p7)
}
  0x11   :  { %54 = dma.hbm_to_vmem [thread:$0]  %s470_s3, 128, %s52_s19, [#allocation8]  }
  0x12   :  { %357 = dma.done.wait [#allocation8], 128  }
  0x13   :  { %358 = vsyncadd [#allocation8], 4294967168  ;;  %vm110_vm0 = vcmask 7168   ;;  %v364_v0 = vmov -1e+30   ;;  %vm131_vm1 = vcmask 261120   ;;  %v139_v15 = vlaneseq }
  0x14   :  { %117 = vst.msk [vmem:[#allocation2] sm:$0xff] %vm110_vm0, %v364_v0  ;;  %v137_v1 = vld [vmem:[%s468_s1] sm:$0xff]  ;;  %v365_v3 = vmov 0   ;;  %v366_v5 = vmov 0.0   ;;  %s368_s10 = smov [#allocation11]  }
  0x15   :  { %v147_v2 = vsel %vm131_vm1, %v137_v1, -inf  ;;  %281 = vset.pattern.permute.xlu0 %v365_v3  ;;  %282 = vset.pattern.permute.xlu1 %v365_v3  ;;  %v172_v4 = vld [vmem:[%s467_s0] sm:$0xff]  ;;  %118 = vst.msk [vmem:[#allocation3] sm:$0xff] %vm110_vm0, %v366_v5  ;;  %111 = vst.msk [vmem:[#allocation5] sm:$0xff] %vm110_vm0, %v366_v5  ;;  %v140_v17 = vand.u32 127, %v139_v15  ;;  %s244_s11 = sshll.u32 %s368_s10, 4  ;;  %s436_s11 = int_to_ptr.vmem [resolvable:$true] %s244_s11 }
  0x16   :  { %148 = vmax.xlane.f32.xlu0 %v147_v2  ;;  %112 = vst.msk [vmem:[#allocation6] sm:$0xff] %vm110_vm0, %v366_v5  ;;  %119 = vst.msk [vmem:[#allocation4] sm:$0xff] %vm110_vm0, %v366_v5  ;;  %175 = vperm.xlu1 %282, %v172_v4   ;;  %v121_v10 = vld [vmem:[#allocation7] sm:$0xff] }
  0x17   :  { %v125_v12 = vmul.f32 1.442695, %v121_v10  ;;  %v120_v16 = vld [vmem:[%s469_s2] sm:$0xff]  ;;  %v122_v19 = vadd.f32 1.0, %v121_v10  ;;  %s367_s2 = smov [#allocation10]  }
  0x18   :  { %v123_v20 = vmul.f32 %v120_v16, %v120_v16  ;;  %s234_s3 = sshll.u32 %s367_s2, 4  ;;  %s235_s3 = int_to_ptr.vmem [resolvable:$true] %s234_s3 }
  0x19   :  { %283 = vpow2.f32 %v125_v12  ;;  %s313_s15 = scalar_lea.vmem %s235_s3, 128  ;;  %p318_p9 = scmp.lt.s32.totalorder %s235_s3, %s235_s3 }
  0x1a   :  { %v124_v22 = vsub.f32 %v122_v19, %v123_v20  ;;  %p314_p8 = scmp.ne.s32.totalorder %s235_s3, %s313_s15  ;;  %p319_p10 = scmp.lt.s32.totalorder %s313_s15, %s313_s15 }
  0x1b   :  { %v145_v6 = vld [vmem:[#allocation2] sm:$0xff] }
  0x1c   :  { %v151_v31 = vld [vmem:[#allocation3] sm:$0xff]  ;;  %v192_v47 = vld [vmem:[#allocation5] sm:$0xff]  ;;  %p320_p11 = por %p319_p10, %p318_p9 }
  0x1d   :  { %v173_v35 = vld [vmem:[#allocation4] sm:$0xff]  ;;  %v128_v38 = vld [vmem:[#allocation6] sm:$0xff] }
  0x1e   :  { %p321_p12 = pnand %p320_p11, %p314_p8 }
  0x23   :  { %v284_v21 = vpop.eup %283 }
  0x24   :  { %v127_v27 = vsub.f32 %v124_v22, %v284_v21 }
  0x26   :  { %v132_v28 = vsel %vm131_vm1, %v127_v27, 0.0 }
  0x95   :  { %v176_v18 = vpop.permute.xlu1 %175 }
  0x96   :  { %vm177_vm2 = vcmp.eq.s32.totalorder %v140_v17, %v176_v18 }
  0x97   :  { %v178_v24 = vsel %vm177_vm2, %v137_v1, 0.0 }
  0x98   :  { %v179_v26 = vsel %vm131_vm1, %v178_v24, 0.0 }
  0xa3   :  { %v149_v7 = vpop.xlane.xlu0 %148 }
  0xa4   :  { %v150_v8 = vmax.f32 %v145_v6, %v149_v7 }
  0xa6   :  { %v152_v9 = vsub.f32 %v145_v6, %v150_v8  ;;  %170 = vst.msk [vmem:[#allocation2] sm:$0xff] %vm110_vm0, %v150_v8  ;;  %158 = vperm.xlu0 %281, %v150_v8  }
  0xa8   :  { %v153_v29 = vmul.f32 1.442695, %v152_v9 }
  0xad   :  { %v187_v46 = vld [vmem:[#allocation2] sm:$0xff] }
 0x125   :  { %v159_v11 = vpop.permute.xlu0 %158 }
 0x126   :  { %v161_v13 = vsub.f32 %v137_v1, %v159_v11 }
 0x128   :  { %v162_v14 = vmul.f32 1.442695, %v161_v13 }
 0x12a   :  { %285 = vpow2.f32 %v162_v14 }
 0x12b   :  { %287 = vpow2.f32 %v153_v29 }
 0x134   :  { %v286_v23 = vpop.eup %285 }
 0x135   :  { %v164_v25 = vsel %vm131_vm1, %v286_v23, 0.0  ;;  %v288_v30 = vpop.eup %287 }
 0x136   :  { %165 = vadd.xlane.f32.xlu1 %v164_v25  ;;  %v155_v32 = vmul.f32 %v288_v30, %v151_v31 }
 0x13a   :  { %180 = vadd.xlane.f32.xlu1 %v179_v26 }
 0x13e   :  { %133 = vadd.xlane.f32.xlu1 %v132_v28 }
 0x1c3   :  { %v166_v33 = vpop.xlane.xlu1 %165 }
 0x1c4   :  { %v167_v34 = vadd.f32 %v166_v33, %v155_v32 }
 0x1c6   :  { %169 = vst.msk [vmem:[#allocation3] sm:$0xff] %vm110_vm0, %v167_v34 }
 0x1c7   :  { %v181_v36 = vpop.xlane.xlu1 %180 }
 0x1c8   :  { %v182_v37 = vadd.f32 %v181_v36, %v173_v35 }
 0x1ca   :  { %183 = vst.msk [vmem:[#allocation4] sm:$0xff] %vm110_vm0, %v182_v37 }
 0x1cb   :  { %v134_v39 = vpop.xlane.xlu1 %133 }
 0x1cc   :  { %v135_v40 = vadd.f32 %v134_v39, %v128_v38 }
 0x1cd   :  { %v188_v41 = vld [vmem:[#allocation3] sm:$0xff] }
 0x1ce   :  { %289 = vlog2.f32 %v188_v41  ;;  %136 = vst.msk [vmem:[#allocation6] sm:$0xff] %vm110_vm0, %v135_v40 }
 0x1d1   :  { %v195_v49 = vld [vmem:[#allocation4] sm:$0xff] }
 0x1d5   :  { %v212_v42 = vld [vmem:[#allocation6] sm:$0xff] }
 0x1d6   :  { %v213_v43 = vsel %vm110_vm0, %v212_v42, 0.0 }
 0x1d7   :  { %214 = vadd.xlane.f32.xlu1 %v213_v43 }
 0x1d8   :  { %v290_v44 = vpop.eup %289 }
 0x1d9   :  { %v190_v45 = vmul.f32 0.6931472, %v290_v44 }
 0x1db   :  { %v191_v48 = vadd.f32 %v190_v45, %v187_v46 }
 0x1dd   :  { %v194_v50 = vadd.f32 %v192_v47, %v191_v48 }
 0x1df   :  { %v196_v51 = vsub.f32 %v194_v50, %v195_v49 }
 0x1e1   :  { %197 = vst.msk [vmem:[#allocation5] sm:$0xff] %vm110_vm0, %v196_v51 }
 0x1e8   :  { %v200_v52 = vld [vmem:[#allocation5] sm:$0xff] }
 0x1e9   :  { %v201_v53 = vsel %vm110_vm0, %v200_v52, 0.0 }
 0x1ea   :  { %202 = vadd.xlane.f32.xlu0 %v201_v53 }
 0x264   :  { %v215_v54 = vpop.xlane.xlu1 %214 }
 0x265   :  { %v216_v55 = vrot.slane %v215_v54, 4 }
 0x267   :  { %v217_v56 = vadd.f32 %v216_v55, %v215_v54 }
 0x269   :  { %v218_v57 = vrot.slane %v217_v56, 2 }
 0x26b   :  { %v219_v61 = vadd.f32 %v218_v57, %v217_v56 }
 0x26d   :  { %v220_v0 = vrot.slane %v219_v61, 1 }
 0x26f   :  { %v221_v3 = vadd.f32 %v220_v0, %v219_v61 }
 0x277   :  { %v203_v58 = vpop.xlane.xlu0 %202 }
 0x278   :  { %v204_v59 = vrot.slane %v203_v58, 4 }
 0x27a   :  { %v205_v60 = vadd.f32 %v204_v59, %v203_v58 }
 0x27c   :  { %v206_v62 = vrot.slane %v205_v60, 2 }
 0x27e   :  { %v207_v63 = vadd.f32 %v206_v62, %v205_v60 }
 0x280   :  { %v208_v1 = vrot.slane %v207_v63, 1 }
 0x282   :  { %v209_v2 = vadd.f32 %v208_v1, %v207_v63 }
 0x284   :  { %271 = vpush %v209_v2 }
 0x285   :  { %273 = vpush %v221_v3 }
 0x2b5   :  { %s272_s9 = spop %271 }
 0x2b6   :  { %s211_s12 = smul.f32 0.125, %s272_s9  ;;  %s274_s13 = spop %273 }
 0x2b7   :  { %s223_s14 = smul.f32 -6.25e-06, %s274_s13 }
 0x2b8   :  { %v224_v4 = vstv %s211_s12 }
 0x2b9   :  { %225 = vst [vmem:[#allocation10] sm:$0xff] %v224_v4  ;;  %v226_v5 = vstv %s223_s14 }
 0x2ba   :  { %227 = vst [vmem:[#allocation11] sm:$0xff] %v226_v5 }
 0x2bb   :  { %324 = shalt.err (!%p321_p12)
}
 0x2bc   :  { %s325_s18 = scalar_lea.hbm %s471_s4, 128 }
 0x2bd   :  { %p326_p13 = scmp.ne.s32.totalorder %s471_s4, %s325_s18  ;;  %p329_p0 = scmp.lt.u32.totalorder %s325_s18, %s471_s4 }
 0x2bf   :  { %p331_p1 = pnand %p329_p0, %p326_p13 }
 0x2c1   :  { %334 = shalt.err (!%p331_p1)
}
 0x2c2   :  { %237 = dma.vmem_to_hbm [thread:$0]  %s235_s3, 128, %s471_s4, [#allocation9]  }
 0x2c3   :  { %s335_s25 = scalar_lea.vmem %s436_s11, 128  ;;  %p340_p3 = scmp.lt.s32.totalorder %s436_s11, %s436_s11 }
 0x2c4   :  { %p336_p2 = scmp.ne.s32.totalorder %s436_s11, %s335_s25  ;;  %p341_p4 = scmp.lt.s32.totalorder %s335_s25, %s335_s25 }
 0x2c6   :  { %p342_p5 = por %p341_p4, %p340_p3 }
 0x2c8   :  { %p343_p6 = pnand %p342_p5, %p336_p2 }
 0x2ca   :  { %346 = shalt.err (!%p343_p6)
}
 0x2cb   :  { %s347_s28 = scalar_lea.hbm %s472_s5, 128 }
 0x2cc   :  { %p348_p7 = scmp.ne.s32.totalorder %s472_s5, %s347_s28  ;;  %p351_p8 = scmp.lt.u32.totalorder %s347_s28, %s472_s5 }
 0x2ce   :  { %p353_p9 = pnand %p351_p8, %p348_p7 }
 0x2d0   :  { %356 = shalt.err (!%p353_p9)
}
 0x2d1   :  { %247 = dma.vmem_to_hbm [thread:$0]  %s436_s11, 128, %s472_s5, [#allocation12]  }
 0x2d2   :  { %359 = dma.done.wait [#allocation9], 128  }
 0x2d3   :  { %360 = vsyncadd [#allocation9], 4294967168 }
 0x2d4   :  { %361 = dma.done.wait [#allocation12], 128  }
 0x2d5   :  { %362 = vsyncadd [#allocation12], 4294967168 }
 0x2d6   :  { %254 = vsyncpa [#allocation8], 1 }
 0x2d7   :  { %255 = vsyncpa [#allocation9], 1 }
 0x2d8   :  { %256 = vsyncpa [#allocation12], 1 }

</bundles_post_ra>
